<compile_context>
chip_gen: v6e
topology: v6e:2x2x1
jax: 0.10.0
libtpu: 0.0.40
codegen_flags: <defaults>
</compile_context>

<pallas_src>
import functools

import jax
import jax.numpy as jnp
from jax import lax
from jax.experimental import pallas as pl
from jax.experimental.pallas import tpu as pltpu


def _round_up(x, m):
    return ((x + m - 1) // m) * m


def _overlap_count(n, p):
    """How many valid (stride-1, no-padding) windows of size p cover index i (float32, >=0)."""
    idx = jnp.arange(n)
    lo = jnp.maximum(0, idx - (p - 1))
    hi = jnp.minimum(idx, n - p)
    return jnp.maximum(hi - lo + 1, 0).astype(jnp.float32)


def _num_tensorcores(default=2):
    """Best-effort TensorCore count (megacore width); falls back to `default`."""
    try:
        info = pltpu.get_tpu_info()
    except Exception:
        info = None
    if info is not None:
        for name in ("num_cores", "core_count", "num_tensorcores",
                     "tensorcore_count", "num_cores_per_chip"):
            v = getattr(info, name, None)
            if isinstance(v, int) and v > 0:
                return v
    try:
        v = getattr(jax.devices()[0], "num_cores", None)
        if isinstance(v, int) and v > 0:
            return v
    except Exception:
        pass
    return default


def _validity_mse_kernel(cnt_ref, r_ref, v_ref, o_ref, acc_ref, *,
                         tm, acc_rows, m_rows, n_blk, n_inner,
                         needs_block_guard, needs_row_mask, native_sub):
    c = pl.program_id(0)          # partial-sum / TensorCore index (parallel axis)
    i = pl.program_id(1)          # row-block index within this partial (reduction axis)

    @pl.when(i == 0)
    def _init():
        acc_ref[...] = jnp.zeros_like(acc_ref)

    blk = c * n_inner + i         # global row-block id handled by this step
    n_sub = tm // acc_rows

    def _chunk_d2(off, masked):
        """Squared difference (f32) of one sublane-aligned (acc_rows, HW) chunk."""
        sl = pl.ds(off, acc_rows)
        r = r_ref[sl, :]
        v = v_ref[sl, :]
        if native_sub:
            d = (r - v).astype(jnp.float32)       # one cast (bf16 VPU path, v6e/v7x)
        else:
            d = r.astype(jnp.float32) - v.astype(jnp.float32)
        d2 = d * d
        if masked:
            rows = (blk * tm + off
                    + lax.broadcasted_iota(jnp.int32, (acc_rows, 1), 0))
            d2 = jnp.where(rows < m_rows, d2, 0.0)
        return d2

    def _accum(masked):
        def _do():
            if n_sub == 1:
                total = _chunk_d2(0, masked)
            else:
                unroll = 4 if n_sub % 4 == 0 else (2 if n_sub % 2 == 0 else 1)

                def body(j, carry):
                    off = pl.multiple_of(j * acc_rows, acc_rows)
                    return carry + _chunk_d2(off, masked)

                total = lax.fori_loop(0, n_sub, body,
                                      jnp.zeros(acc_ref.shape, jnp.float32),
                                      unroll=unroll)
            acc_ref[...] += total
        return _do

    last = n_blk - 1
    if needs_row_mask:
        # Mask only the final (padded) block; all others run the unmasked fast path.
        # (Steps clamped past the last block fall into neither branch and are skipped.)
        pl.when(blk < last)(_accum(False))
        pl.when(blk == last)(_accum(True))
    elif needs_block_guard:
        # Tail steps whose block id was clamped in the index_map contribute nothing.
        pl.when(blk < n_blk)(_accum(False))
    else:
        _accum(False)()

    @pl.when(i == n_inner - 1)
    def _finalize():
        # Hoisted overlap-count weighting + single cross-lane reduction per partial.
        o_ref[0, 0] = jnp.sum(acc_ref[...] * cnt_ref[...])


def validity_loss(result, validity_tensor, validity_patch_size=(1, 5, 5), *,
                  max_block_bytes=4 << 20, block_rows=None, num_partials=None,
                  native_dtype_subtract=None):
    """Equivalent of ValidityLoss.forward with MSE(reduction='sum')."""
    assert validity_patch_size[0] == 1, "frame-by-frame patching (pT must be 1)"
    B, C, T, H, W = result.shape
    _, pH, pW = validity_patch_size
    M = B * C * T
    HW = H * W

    # Lane-dense flat layout: rows = (b,c,t) slices, last dim = H*W.
    # TODO(synk): if H*W is not a multiple of 128 each row is lane-padded to the next vreg
    # boundary; fine where HBM-bound (v5e/v6e), consider padding HW (and cnt) on v7x.
    r2 = result.reshape(M, HW)
    v2 = validity_tensor.reshape(M, HW)
    cnt = (_overlap_count(H, pH)[:, None]
           * _overlap_count(W, pW)[None, :]).reshape(1, HW)   # patch-overlap counts

    itemsize = result.dtype.itemsize
    sub_tile = {1: 32, 2: 16}.get(itemsize, 8)        # native sublane tile for the dtype

    # Inner-chunk / accumulator rows: sublane-tile aligned, f32 carry stays <= ~32 KiB.
    acc_rows = max(sub_tile,
                   min(512, ((32 * 1024) // max(1, HW * 4)) // sub_tile * sub_tile))

    # Row block per grid step: ~max_block_bytes per input, multiple of acc_rows.
    if block_rows is None:
        tm = max(acc_rows,
                 (max_block_bytes // max(1, HW * itemsize)) // acc_rows * acc_rows)
    else:
        tm = max(acc_rows, _round_up(block_rows, acc_rows))
    tm = min(tm, _round_up(M, acc_rows))

    n_blk = pl.cdiv(M, tm)
    if num_partials is None:
        num_partials = _num_tensorcores(default=2)
    n_part = max(1, min(num_partials, 2, n_blk))       # megacore width is at most 2
    n_inner = pl.cdiv(n_blk, n_part)
    needs_block_guard = (n_part * n_inner) != n_blk    # some steps map past the last block
    needs_row_mask = (n_blk * tm) != M                 # last block has padded rows

    if native_dtype_subtract is None:
        # bf16 subtract runs at packed VPU rate on v6e/v7x; still correct (just slower) on v5e.
        native_dtype_subtract = (result.dtype == jnp.bfloat16)

    kernel = functools.partial(
        _validity_mse_kernel,
        tm=tm, acc_rows=acc_rows, m_rows=M, n_blk=n_blk, n_inner=n_inner,
        needs_block_guard=needs_block_guard, needs_row_mask=needs_row_mask,
        native_sub=native_dtype_subtract)

    def _row_block(c, i):
        b = c * n_inner + i
        if needs_block_guard:
            b = jnp.minimum(b, n_blk - 1)   # keep DMA in bounds; kernel gates the math
        return (b, 0)

    # 2 inputs x 2 pipeline buffers + (double-buffered) cnt row + small f32 accumulator.
    vmem_needed = 2 * 2 * tm * HW * itemsize + 2 * HW * 4 + acc_rows * HW * 4
    vmem_limit = int(min(max(vmem_needed + (4 << 20), 32 << 20), 64 << 20))

    partials = pl.pallas_call(
        kernel,
        out_shape=jax.ShapeDtypeStruct((n_part, 1), jnp.float32),
        grid_spec=pltpu.PrefetchScalarGridSpec(
            num_scalar_prefetch=0,
            grid=(n_part, n_inner),
            in_specs=[
                pl.BlockSpec((1, HW), lambda c, i: (0, 0)),   # overlap-count row (reused)
                pl.BlockSpec((tm, HW), _row_block),           # result rows
                pl.BlockSpec((tm, HW), _row_block),           # validity rows
            ],
            out_specs=pl.BlockSpec((1, 1), lambda c, i: (c, 0),
                                   memory_space=pltpu.SMEM),
            scratch_shapes=[pltpu.VMEM((acc_rows, HW), jnp.float32)],
        ),
        compiler_params=pltpu.CompilerParams(
            dimension_semantics=("parallel", "arbitrary"),
            vmem_limit_bytes=vmem_limit),
    )(cnt, r2, v2)
    return jnp.sum(partials)


# TODO(synk): only the 'MSE' branch of define_loss() is implemented; the 'weighted_MSE'
# (weights-video unfold) and 'L1' branches are not exercised.


def _reference_loss(result, validity_tensor, validity_patch_size=(1, 5, 5)):
    """Pure-JAX reference: explicit stride-1 valid patch extraction + sum of squares."""
    _, pH, pW = validity_patch_size
    H, W = result.shape[-2:]
    d2 = (result.astype(jnp.float32) - validity_tensor.astype(jnp.float32)) ** 2
    total = jnp.float32(0.0)
    for i in range(H - pH + 1):
        for j in range(W - pW + 1):
            total = total + jnp.sum(d2[..., i:i + pH, j:j + pW])
    return total


if __name__ == "__main__":
    # Small shapes consistent with the module: video (B, C, T, H, W).
    B, C, T, H, W = 2, 3, 4, 16, 16
    key = jax.random.PRNGKey(0)
    k1, k2, k3, k4 = jax.random.split(key, 4)

    result = jax.random.normal(k1, (B, C, T, H, W), dtype=jnp.float32)
    validity = jax.random.normal(k2, (B, C, T, H, W), dtype=jnp.float32)

    ref = jax.block_until_ready(_reference_loss(result, validity))
    loss = jax.block_until_ready(validity_loss(result, validity))
    assert jnp.allclose(loss, ref, rtol=1e-3, atol=1e-2), (loss, ref)

    # bf16 inputs: exercises the single-cast (native-dtype subtract) path.
    r_bf = result.astype(jnp.bfloat16)
    v_bf = validity.astype(jnp.bfloat16)
    ref_bf = jax.block_until_ready(_reference_loss(r_bf, v_bf))
    loss_bf = jax.block_until_ready(validity_loss(r_bf, v_bf))
    assert jnp.allclose(loss_bf, ref_bf, rtol=5e-2), (loss_bf, ref_bf)

    # Larger M: exercises multi-block streaming, the inner chunk loop, the block guard
    # and the padded-tail row mask.
    T2 = 64
    result2 = jax.random.normal(k3, (B, C, T2, H, W), dtype=jnp.float32)
    validity2 = jax.random.normal(k4, (B, C, T2, H, W), dtype=jnp.float32)
    ref2 = jax.block_until_ready(_reference_loss(result2, validity2))

    l_even = jax.block_until_ready(validity_loss(result2, validity2, block_rows=64))
    assert jnp.allclose(l_even, ref2, rtol=1e-3, atol=1e-2), (l_even, ref2)

    l_odd = jax.block_until_ready(validity_loss(result2, validity2, block_rows=160))
    assert jnp.allclose(l_odd, ref2, rtol=1e-3, atol=1e-2), (l_odd, ref2)

    l_def = jax.block_until_ready(validity_loss(result2, validity2))
    assert jnp.allclose(l_def, ref2, rtol=1e-3, atol=1e-2), (l_def, ref2)

    print("KERNEL_OK")
</pallas_src>

<mosaic_0001>
module attributes {stable_mosaic.version = 11 : i64} {
  func.func @_validity_mse_kernel(%arg0: i32, %arg1: i32, %arg2: memref<1x256xf32, #tpu.memory_space<vmem>>, %arg3: memref<32x256xf32, #tpu.memory_space<vmem>>, %arg4: memref<32x256xf32, #tpu.memory_space<vmem>>, %arg5: memref<1x1xf32, #tpu.memory_space<smem>>, %arg6: memref<32x256xf32, #tpu.memory_space<vmem>>) attributes {dimension_semantics = [#tpu.dimension_semantics<parallel>, #tpu.dimension_semantics<arbitrary>], iteration_bounds = array<i64: 1, 1>, scalar_prefetch = 0 : i64, scratch_operands = 1 : i64, tpu.core_type = #tpu.core_type<tc>, window_params = [{pipeline_mode = #tpu.pipeline_mode<synchronous>, transform_indices = @transform_0, window_bounds = array<i64: 1, 256>}, {transform_indices = @transform_1, window_bounds = array<i64: 32, 256>}, {transform_indices = @transform_2, window_bounds = array<i64: 32, 256>}, {transform_indices = @transform_3, window_bounds = array<i64: 1, 1>}]} {
    %c0_i32 = arith.constant 0 : i32
    %0 = arith.cmpi eq, %arg1, %c0_i32 : i32
    %1 = arith.extui %0 : i1 to i32
    %c0_i32_0 = arith.constant 0 : i32
    %2 = arith.cmpi ne, %1, %c0_i32_0 : i32
    scf.if %2 {
      %cst = arith.constant 0.000000e+00 : f32
      %14 = vector.broadcast %cst : f32 to vector<32x256xf32>
      %c0 = arith.constant 0 : index
      %c0_7 = arith.constant 0 : index
      %15 = vector.load %arg6[%c0, %c0_7] : memref<32x256xf32, #tpu.memory_space<vmem>>, vector<32x256xf32>
      tpu.vector_store %arg6[%c0, %c0_7], %14 {strides = array<i32>} : memref<32x256xf32, #tpu.memory_space<vmem>>, vector<32x256xf32>,
    } else {
    }
    %c1_i32 = arith.constant 1 : i32
    %3 = arith.muli %arg0, %c1_i32 : i32
    %4 = arith.addi %3, %arg1 : i32
    %c0_i32_1 = arith.constant 0 : i32
    %5 = arith.cmpi slt, %4, %c0_i32_1 : i32
    %6 = arith.extui %5 : i1 to i32
    %c0_i32_2 = arith.constant 0 : i32
    %7 = arith.cmpi ne, %6, %c0_i32_2 : i32
    scf.if %7 {
      %c0 = arith.constant 0 : index
      %c0_7 = arith.constant 0 : index
      %14 = vector.load %arg3[%c0, %c0_7] : memref<32x256xf32, #tpu.memory_space<vmem>>, vector<32x256xf32>
      %c0_8 = arith.constant 0 : index
      %c0_9 = arith.constant 0 : index
      %15 = vector.load %arg4[%c0_8, %c0_9] : memref<32x256xf32, #tpu.memory_space<vmem>>, vector<32x256xf32>
      %16 = arith.subf %14, %15 : vector<32x256xf32>
      %17 = arith.mulf %16, %16 : vector<32x256xf32>
      %c0_10 = arith.constant 0 : index
      %c0_11 = arith.constant 0 : index
      %18 = vector.load %arg6[%c0_10, %c0_11] : memref<32x256xf32, #tpu.memory_space<vmem>>, vector<32x256xf32>
      %19 = arith.addf %18, %17 : vector<32x256xf32>
      %c0_12 = arith.constant 0 : index
      %c0_13 = arith.constant 0 : index
      %20 = vector.load %arg6[%c0_12, %c0_13] : memref<32x256xf32, #tpu.memory_space<vmem>>, vector<32x256xf32>
      tpu.vector_store %arg6[%c0_12, %c0_13], %19 {strides = array<i32>} : memref<32x256xf32, #tpu.memory_space<vmem>>, vector<32x256xf32>,
    } else {
    }
    %c0_i32_3 = arith.constant 0 : i32
    %8 = arith.cmpi eq, %4, %c0_i32_3 : i32
    %9 = arith.extui %8 : i1 to i32
    %c0_i32_4 = arith.constant 0 : i32
    %10 = arith.cmpi ne, %9, %c0_i32_4 : i32
    scf.if %10 {
      %c0 = arith.constant 0 : index
      %c0_7 = arith.constant 0 : index
      %14 = vector.load %arg3[%c0, %c0_7] : memref<32x256xf32, #tpu.memory_space<vmem>>, vector<32x256xf32>
      %c0_8 = arith.constant 0 : index
      %c0_9 = arith.constant 0 : index
      %15 = vector.load %arg4[%c0_8, %c0_9] : memref<32x256xf32, #tpu.memory_space<vmem>>, vector<32x256xf32>
      %16 = arith.subf %14, %15 : vector<32x256xf32>
      %17 = arith.mulf %16, %16 : vector<32x256xf32>
      %c32_i32 = arith.constant 32 : i32
      %18 = arith.muli %4, %c32_i32 : i32
      %c0_i32_10 = arith.constant 0 : i32
      %19 = arith.addi %18, %c0_i32_10 : i32
      %20 = tpu.iota {dimensions = array<i32: 0>} : vector<32x1xi32>
      %21 = vector.broadcast %19 : i32 to vector<32x1xi32>
      %22 = arith.addi %21, %20 : vector<32x1xi32>
      %c24_i32 = arith.constant 24 : i32
      %23 = vector.broadcast %c24_i32 : i32 to vector<32x1xi32>
      %24 = arith.cmpi slt, %22, %23 : vector<32x1xi32>
      %cst = arith.constant 0.000000e+00 : f32
      %25 = vector.shape_cast %24 : vector<32x1xi1> to vector<32x1xi1>
      %26 = vector.broadcast %25 : vector<32x1xi1> to vector<32x256xi1>
      %27 = vector.broadcast %cst : f32 to vector<32x256xf32>
      %28 = arith.select %26, %17, %27 : vector<32x256xi1>, vector<32x256xf32>
      %c0_11 = arith.constant 0 : index
      %c0_12 = arith.constant 0 : index
      %29 = vector.load %arg6[%c0_11, %c0_12] : memref<32x256xf32, #tpu.memory_space<vmem>>, vector<32x256xf32>
      %30 = arith.addf %29, %28 : vector<32x256xf32>
      %c0_13 = arith.constant 0 : index
      %c0_14 = arith.constant 0 : index
      %31 = vector.load %arg6[%c0_13, %c0_14] : memref<32x256xf32, #tpu.memory_space<vmem>>, vector<32x256xf32>
      tpu.vector_store %arg6[%c0_13, %c0_14], %30 {strides = array<i32>} : memref<32x256xf32, #tpu.memory_space<vmem>>, vector<32x256xf32>,
    } else {
    }
    %c0_i32_5 = arith.constant 0 : i32
    %11 = arith.cmpi eq, %arg1, %c0_i32_5 : i32
    %12 = arith.extui %11 : i1 to i32
    %c0_i32_6 = arith.constant 0 : i32
    %13 = arith.cmpi ne, %12, %c0_i32_6 : i32
    scf.if %13 {
      %c0 = arith.constant 0 : index
      %c0_7 = arith.constant 0 : index
      %14 = vector.load %arg6[%c0, %c0_7] : memref<32x256xf32, #tpu.memory_space<vmem>>, vector<32x256xf32>
      %c0_8 = arith.constant 0 : index
      %c0_9 = arith.constant 0 : index
      %15 = vector.load %arg2[%c0_8, %c0_9] : memref<1x256xf32, #tpu.memory_space<vmem>>, vector<1x256xf32>
      %16 = vector.broadcast %15 : vector<1x256xf32> to vector<32x256xf32>
      %17 = arith.mulf %14, %16 : vector<32x256xf32>
      %18 = vector.shape_cast %17 : vector<32x256xf32> to vector<1x32x256xf32>
      %cst = arith.constant dense<0.000000e+00> : vector<1xf32>
      %19 = vector.multi_reduction <add>, %18, %cst [1, 2] : vector<1x32x256xf32> to vector<1xf32>
      %20 = vector.shape_cast %19 : vector<1xf32> to vector<1x1x1xf32>
      %21 = vector.extract %20[0, 0, 0] : f32 from vector<1x1x1xf32>
      %c0_10 = arith.constant 0 : index
      %c0_11 = arith.constant 0 : index
      %22 = memref.load %arg5[%c0_10, %c0_11] : memref<1x1xf32, #tpu.memory_space<smem>>
      memref.store %21, %arg5[%c0_10, %c0_11] : memref<1x1xf32, #tpu.memory_space<smem>>
    } else {
    }
    return
  }
  func.func @transform_0(%arg0: i32, %arg1: i32) -> (i32, i32) {
    %c0_i32 = arith.constant 0 : i32
    %c0_i32_0 = arith.constant 0 : i32
    %c0_i32_1 = arith.constant 0 : i32
    return %c0_i32, %c0_i32_0 : i32, i32
  }
  func.func @transform_1(%arg0: i32, %arg1: i32) -> (i32, i32) {
    %c1_i32 = arith.constant 1 : i32
    %0 = arith.muli %arg0, %c1_i32 : i32
    %1 = arith.addi %0, %arg1 : i32
    %c0_i32 = arith.constant 0 : i32
    %c0_i32_0 = arith.constant 0 : i32
    return %1, %c0_i32 : i32, i32
  }
  func.func @transform_2(%arg0: i32, %arg1: i32) -> (i32, i32) {
    %c1_i32 = arith.constant 1 : i32
    %0 = arith.muli %arg0, %c1_i32 : i32
    %1 = arith.addi %0, %arg1 : i32
    %c0_i32 = arith.constant 0 : i32
    %c0_i32_0 = arith.constant 0 : i32
    return %1, %c0_i32 : i32, i32
  }
  func.func @transform_3(%arg0: i32, %arg1: i32) -> (i32, i32) {
    %c0_i32 = arith.constant 0 : i32
    %c0_i32_0 = arith.constant 0 : i32
    return %arg0, %c0_i32 : i32, i32
  }
}

</mosaic_0001>

<bundles_post_ra>
// kernel: tpu_custom_call.1
= control target key start
LH: loop header
LB: loop body
LE: loop exit
PB: predicated region body
PF: predicated region fallthrough
CT: control target
= control target key end

     0   :  { %8 = vsyncpa [#allocation4], 0  ;;  %s432_s0 = inlined_call_operand.hbm [shape: f32[1,256], index: 0, kind: input, shape index: {}]   ;;  %s433_s1 = inlined_call_operand.hbm [shape: f32[24,256], index: 1, kind: input, shape index: {}]   ;;  %s434_s2 = inlined_call_operand.hbm [shape: f32[24,256], index: 2, kind: input, shape index: {}]   ;;  %s435_s3 = inlined_call_operand.hbm [shape: f32[1,1], index: 3, kind: output, shape index: {}]  }
   0x1   :  { %9 = vsyncpa [#allocation7], 0 }
   0x2   :  { %10 = vsyncpa [#allocation5], 0  ;;  %s394_s12 = smov [#allocation3]  }
   0x3   :  { %s17_s13 = sshll.u32 %s394_s12, 4  ;;  %s18_s13 = int_to_ptr.vmem [resolvable:$true] %s17_s13 }
   0x4   :  { %s328_s14 = scalar_lea.vmem %s18_s13, 32  ;;  %p333_p1 = scmp.lt.s32.totalorder %s18_s13, %s18_s13 }
   0x5   :  { %p329_p0 = scmp.ne.s32.totalorder %s18_s13, %s328_s14  ;;  %p334_p2 = scmp.lt.s32.totalorder %s328_s14, %s328_s14 }
   0x7   :  { %p335_p3 = por %p334_p2, %p333_p1 }
   0x9   :  { %p336_p4 = pnand %p335_p3, %p329_p0 }
   0xb   :  { %339 = shalt.err (!%p336_p4)
}
   0xc   :  { %20 = dma.hbm_to_vmem [thread:$0]  %s432_s0, 32, %s18_s13, [#allocation4]  }
   0xd   :  { %30 = vsyncadd [#allocation7], 256  ;;  %s395_s17 = smov [#allocation6]  }
   0xe   :  { %s36_s18 = sshll.u32 %s395_s17, 4  ;;  %s37_s18 = int_to_ptr.vmem [resolvable:$true] %s36_s18 }
   0xf   :  { %s348_s19 = scalar_lea.vmem %s37_s18, 768  ;;  %s352_s20 = scalar_lea.vmem %s37_s18, 1024 }
  0x10   :  { %p349_p5 = scmp.ne.s32.totalorder %s37_s18, %s348_s19  ;;  %p353_p6 = scmp.lt.s32.totalorder %s37_s18, %s37_s18 }
  0x11   :  { %p354_p7 = scmp.lt.s32.totalorder %s352_s20, %s348_s19 }
  0x13   :  { %p355_p8 = por %p354_p7, %p353_p6 }
  0x15   :  { %p356_p9 = pnand %p355_p8, %p349_p5 }
  0x17   :  { %359 = shalt.err (!%p356_p9)
}
  0x18   :  { %s396_s21 = smov 256   ;;  %s397_s22 = smov 16  }
  0x19   :  { %42 = dma.hbm_to_vmem [thread:$0]  %s433_s1, 768, %s37_s18, [#allocation7], %s396_s21, %s396_s21, %s397_s22  }
  0x1a   :  { %52 = vsyncadd [#allocation7], 256  ;;  %s398_s0 = smov [#allocation8]  }
  0x1b   :  { %s58_s25 = sshll.u32 %s398_s0, 4  ;;  %s59_s25 = int_to_ptr.vmem [resolvable:$true] %s58_s25 }
  0x1c   :  { %s368_s26 = scalar_lea.vmem %s59_s25, 768  ;;  %s372_s27 = scalar_lea.vmem %s59_s25, 1024 }
  0x1d   :  { %p369_p10 = scmp.ne.s32.totalorder %s59_s25, %s368_s26  ;;  %p373_p11 = scmp.lt.s32.totalorder %s59_s25, %s59_s25 }
  0x1e   :  { %p374_p12 = scmp.lt.s32.totalorder %s372_s27, %s368_s26 }
  0x20   :  { %p375_p13 = por %p374_p12, %p373_p11 }
  0x22   :  { %p376_p0 = pnand %p375_p13, %p369_p10 }
  0x24   :  { %379 = shalt.err (!%p376_p0)
}
  0x25   :  { %64 = dma.hbm_to_vmem [thread:$0]  %s434_s2, 768, %s59_s25, [#allocation7], %s396_s21, %s396_s21, %s397_s22  }
  0x26   :  { %388 = dma.done.wait [#allocation4], 32  }
  0x27   :  { %389 = vsyncadd [#allocation4], 4294967264 }
  0x28   :  { %390 = dma.done.wait [#allocation7], 2048  }
  0x29   :  { %391 = vsyncadd [#allocation7], 4294965248  ;;  %v261_v0 = vlaneseq  ;;  %v161_v2 = vld [vmem:[#allocation6] sm:$0xff]  ;;  %v162_v3 = vld [vmem:[#allocation6 + $0x8] sm:$0xff]  ;;  %s399_s2 = smov [#allocation9]  }
  0x2a   :  { %v163_v4 = vld [vmem:[#allocation6 + $0x10] sm:$0xff]  ;;  %v164_v5 = vld [vmem:[#allocation6 + $0x18] sm:$0xff]  ;;  %v165_v6 = vld [vmem:[#allocation6 + $0x20] sm:$0xff] }
  0x2b   :  { %v262_v1 = vshrl.u32 %v261_v0, 7  ;;  %v166_v7 = vld [vmem:[#allocation6 + $0x28] sm:$0xff]  ;;  %v169_v9 = vld [vmem:[#allocation8] sm:$0xff]  ;;  %v171_v11 = vld [vmem:[#allocation8 + $0x10] sm:$0xff] }
  0x2c   :  { %v170_v10 = vld [vmem:[#allocation8 + $0x8] sm:$0xff]  ;;  %v172_v13 = vld [vmem:[#allocation8 + $0x18] sm:$0xff]  ;;  %v173_v14 = vld [vmem:[#allocation8 + $0x20] sm:$0xff]  ;;  %v177_v16 = vsub.f32 %v161_v2, %v169_v9  ;;  %v179_v18 = vsub.f32 %v163_v4, %v171_v11 }
  0x2d   :  { %v263_v8 = vsub.s32 0, %v262_v1  ;;  %v267_v12 = vsub.s32 1, %v262_v1  ;;  %v174_v15 = vld [vmem:[#allocation8 + $0x28] sm:$0xff]  ;;  %v178_v17 = vsub.f32 %v162_v3, %v170_v10  ;;  %v180_v19 = vsub.f32 %v164_v5, %v172_v13  ;;  %v259_v21 = vld [vmem:[#allocation3] sm:$0x3] }
  0x2e   :  { %v181_v20 = vsub.f32 %v165_v6, %v173_v14  ;;  %v185_v22 = vmul.f32 %v177_v16, %v177_v16  ;;  %v187_v24 = vmul.f32 %v179_v18, %v179_v18  ;;  %v182_v26 = vsub.f32 %v166_v7, %v174_v15 }
  0x2f   :  { %v186_v23 = vmul.f32 %v178_v17, %v178_v17  ;;  %v264_v25 = vrot.slane %v259_v21, %v263_v8  ;;  %v188_v27 = vmul.f32 %v180_v19, %v180_v19  ;;  %v268_v28 = vrot.slane %v259_v21, %v267_v12 }
  0x30   :  { %v189_v30 = vmul.f32 %v181_v20, %v181_v20  ;;  %v190_v33 = vmul.f32 %v182_v26, %v182_v26 }
  0x31   :  { %v271_v29 = vmul.f32 %v264_v25, %v185_v22  ;;  %v272_v31 = vmul.f32 %v268_v28, %v186_v23  ;;  %v273_v32 = vmul.f32 %v264_v25, %v187_v24  ;;  %v274_v34 = vmul.f32 %v268_v28, %v188_v27 }
  0x32   :  { %v275_v36 = vmul.f32 %v264_v25, %v189_v30  ;;  %v276_v38 = vmul.f32 %v268_v28, %v190_v33  ;;  %v277_v40 = vmul.f32 0.0, %v264_v25  ;;  %v278_v42 = vmul.f32 0.0, %v268_v28 }
  0x33   :  { %v279_v35 = vadd.f32 %v272_v31, %v271_v29 }
  0x35   :  { %v280_v37 = vadd.f32 %v279_v35, %v273_v32 }
  0x37   :  { %v281_v39 = vadd.f32 %v280_v37, %v274_v34 }
  0x39   :  { %v282_v41 = vadd.f32 %v281_v39, %v275_v36 }
  0x3b   :  { %v283_v43 = vadd.f32 %v282_v41, %v276_v38 }
  0x3d   :  { %v284_v44 = vadd.f32 %v283_v43, %v277_v40 }
  0x3f   :  { %v285_v45 = vadd.f32 %v284_v44, %v278_v42 }
  0x41   :  { %286 = vadd.xlane.f32.xlu0 %v285_v45 }
  0xca   :  { %v287_v46 = vpop.xlane.xlu0 %286 }
  0xcb   :  { %v288_v47 = vrot.slane %v287_v46, 4 }
  0xcd   :  { %v289_v48 = vadd.f32 %v288_v47, %v287_v46 }
  0xcf   :  { %v290_v49 = vrot.slane %v289_v48, 2 }
  0xd1   :  { %v291_v50 = vadd.f32 %v290_v49, %v289_v48 }
  0xd3   :  { %v292_v51 = vrot.slane %v291_v50, 1 }
  0xd5   :  { %v293_v52 = vadd.f32 %v292_v51, %v291_v50 }
  0xd7   :  { %312 = vpush %v293_v52 }
 0x108   :  { %s313_s1 = spop %312 }
 0x109   :  { %296 = sst [smem:[#allocation9]] %s313_s1 }
 0x10a   :  { %304 = dma.smem_to_hbm %s399_s2, 16, %s435_s3, [#allocation5]  }
 0x10b   :  { %392 = dma.done.wait [#allocation5], 16  }
 0x10c   :  { %393 = vsyncadd [#allocation5], 4294967280 }
 0x10d   :  { %308 = sfence }
 0x10e   :  { %309 = vsyncpa [#allocation4], 1 }
 0x10f   :  { %310 = vsyncpa [#allocation7], 1 }
 0x110   :  { %311 = vsyncpa [#allocation5], 1 }

</bundles_post_ra>
